<compile_context>
chip_gen: v7x
topology: tpu7x:2x2x1
jax: 0.10.0
libtpu: 0.0.40
codegen_flags: <defaults>
</compile_context>

<pallas_src>
import jax
import jax.numpy as jnp
from jax.experimental import pallas as pl
from jax.experimental.pallas import tpu as pltpu


def _sublane_multiple(dtype):
    # f32 -> 8, bf16 -> 16, int8/fp8 -> 32 (sublane packing of the vreg).
    itemsize = jnp.dtype(dtype).itemsize
    return max(8, 32 // itemsize)


def _round_up(n, m):
    return ((n + m - 1) // m) * m


def _largest_divisor_leq(n, cap):
    cap = max(1, min(n, cap))
    for d in range(cap, 0, -1):
        if n % d == 0:
            return d
    return 1


def _budgets():
    """Return (per-buffer tile budget, vmem_limit_bytes), generation-aware."""
    vmem_cap = 64 * 1024 * 1024  # conservative default = v7x per-TensorCore
    try:
        info = pltpu.get_tpu_info()
        vmem_cap = int(getattr(info, "vmem_capacity_bytes", vmem_cap))
    except Exception:
        pass
    if vmem_cap >= 96 * 1024 * 1024:
        # v5e / v6e: 128 MiB VMEM -> big tiles amortize the fixed per-step cost
        # (6 live buffers x 6 MiB = 36 MiB, comfortably under the 56 MiB limit).
        return 6 * 1024 * 1024, 56 * 1024 * 1024
    # v7x: only 64 MiB per TensorCore and both cores run under "parallel".
    return 4 * 1024 * 1024, 36 * 1024 * 1024


def _add_kernel(x_ref, pos_ref, o_ref):
    # 3-D path : x (tb, ts, D) + pos (ts, D)  -> broadcasts over tb
    # flat path: x (tbf, tf)   + pos (1, tf)  -> broadcasts over sublanes
    o_ref[...] = x_ref[...] + pos_ref[...]


def _pos_add_seq_tiled(x, pos_table):
    """D % 128 == 0: tile the sequence axis, index the learned table directly
    (no HBM slice copy), reuse the pos tile across the innermost batch axis."""
    B, S, D = x.shape
    itemsize = jnp.dtype(x.dtype).itemsize
    sub = _sublane_multiple(x.dtype)
    tile_bytes, vmem_limit = _budgets()

    if S >= sub:
        # ts stays a multiple of the sublane count and never exceeds S, so the
        # (ts, D) block is legal against both (B, S, D) and (max_seq_len, D);
        # a non-dividing last seq tile is handled by masked partial stores.
        ts_budget = max(sub, (tile_bytes // (D * itemsize)) // sub * sub)
        ts = min(ts_budget, (S // sub) * sub)
        pos_arg = pos_table          # learned table indexed in place
    else:
        # Tiny sequence: use the exact full-dim block (always legal) and pay
        # for a negligible (S, D) slice copy.
        ts = S
        pos_arg = pos_table[:S]
    n_s = pl.cdiv(S, ts)

    # Fold batches into a grid step while the per-step slab is small.
    tb_cap = max(1, tile_bytes // (ts * D * itemsize))
    tb = _largest_divisor_leq(B, tb_cap)
    n_b = pl.cdiv(B, tb)

    # Never compile a 1-point grid for non-trivial shapes: a single step would
    # leave one of v7x's two TensorCores (half the HBM bandwidth) idle.
    if n_s * n_b < 2:
        if B >= 2:
            tb = _largest_divisor_leq(B, B // 2)
            n_b = pl.cdiv(B, tb)
        elif S > sub:
            ts = max(sub, _round_up(pl.cdiv(S, 2), sub))
            n_s = pl.cdiv(S, ts)

    return pl.pallas_call(
        _add_kernel,
        out_shape=jax.ShapeDtypeStruct((B, S, D), x.dtype),
        grid=(n_s, n_b),  # batch innermost -> pos block index constant, DMA reused
        in_specs=[
            pl.BlockSpec((tb, ts, D), lambda s, b: (b, s, 0)),   # x
            # TODO(synk): single-buffer this spec (pipeline_mode=pl.Buffered(1))
            # once verified against the Mosaic dump; its index is constant in b.
            pl.BlockSpec((ts, D), lambda s, b: (s, 0)),          # pos table
        ],
        out_specs=pl.BlockSpec((tb, ts, D), lambda s, b: (b, s, 0)),
        compiler_params=pltpu.CompilerParams(
            dimension_semantics=("parallel", "parallel"),
            vmem_limit_bytes=vmem_limit,
        ),
    )(x, pos_arg)


def _pos_add_lane_dense(x, pos):
    """D % 128 != 0: flatten (S, D) into one lane-dense axis so output stores
    are unmasked full-lane vst; the batch lives in the sublane dim."""
    B, S, D = x.shape
    F = S * D
    itemsize = jnp.dtype(x.dtype).itemsize
    sub = _sublane_multiple(x.dtype)
    tile_bytes, vmem_limit = _budgets()
    vmem_per_buf = max(tile_bytes, vmem_limit // 6)

    # Rows per block: whole batch, unless its sublane-padded footprint at the
    # minimum lane tile (128) would already blow the per-buffer budget.
    rows_padded = _round_up(B, sub)
    max_rows = max(sub, (vmem_per_buf // (128 * itemsize)) // sub * sub)
    tbf = B if rows_padded <= max_rows else max_rows
    rows_eff = _round_up(tbf, sub)
    n_bb = pl.cdiv(B, tbf)

    # Lane tile: sized from *real* HBM bytes per step (tbf rows), capped by the
    # sublane-padded VMEM footprint of the tile.
    tf_hbm = max(1, tile_bytes // (min(tbf, B) * itemsize))
    tf_vmem = max(1, vmem_per_buf // (rows_eff * itemsize))
    tf = max(128, (min(tf_hbm, tf_vmem) // 128) * 128)
    if tf >= F:
        # Keep >= 2 grid steps when the flattened axis allows it (v7x megacore).
        tf = _round_up(pl.cdiv(F, 2), 128) if F >= 256 else F
    n_f = pl.cdiv(F, tf)

    xf = x.reshape(B, F)        # contiguous row-major reshape: layout-free
    posf = pos.reshape(1, F)

    out = pl.pallas_call(
        _add_kernel,
        out_shape=jax.ShapeDtypeStruct((B, F), x.dtype),
        grid=(n_f, n_bb),  # batch innermost -> pos tile reused across batch blocks
        in_specs=[
            pl.BlockSpec((tbf, tf), lambda f, b: (b, f)),   # x
            pl.BlockSpec((1, tf), lambda f, b: (0, f)),     # pos (sublane bcast)
        ],
        out_specs=pl.BlockSpec((tbf, tf), lambda f, b: (b, f)),
        compiler_params=pltpu.CompilerParams(
            dimension_semantics=("parallel", "parallel"),
            vmem_limit_bytes=vmem_limit,
        ),
    )(xf, posf)
    return out.reshape(B, S, D)


def learned_positional_encoding(x, pos_table):
    """x: (B, S, D); pos_table: (max_seq_len, D). Returns x + pos_table[:S]."""
    B, S, D = x.shape
    max_seq_len, Dt = pos_table.shape
    assert Dt == D and S <= max_seq_len
    if D % 128 == 0:
        return _pos_add_seq_tiled(x, pos_table)
    # positions = arange(S) => contiguous slice of the learned table
    return _pos_add_lane_dense(x, pos_table[:S])


if __name__ == "__main__":
    key = jax.random.PRNGKey(0)
    k1, k2, k3, k4, k5, k6 = jax.random.split(key, 6)

    # --- Case 1: module-default-ish small shapes (D=32 -> lane-dense flat path)
    B, S, D, L = 2, 8, 32, 64
    x = jax.random.normal(k1, (B, S, D), dtype=jnp.float32)
    tbl = jax.random.normal(k2, (L, D), dtype=jnp.float32)
    out = jax.block_until_ready(learned_positional_encoding(x, tbl))
    ref = x + tbl[:S][None, :, :]
    assert out.shape == (B, S, D)
    assert jnp.allclose(out, ref, atol=1e-6), "mismatch (flat path)"

    # --- Case 2: D multiple of 128 -> seq-tiled 3-D path, table indexed in place
    B2, S2, D2, L2 = 2, 16, 128, 64
    x2 = jax.random.normal(k3, (B2, S2, D2), dtype=jnp.float32)
    tbl2 = jax.random.normal(k4, (L2, D2), dtype=jnp.float32)
    out2 = jax.block_until_ready(learned_positional_encoding(x2, tbl2))
    ref2 = x2 + tbl2[:S2][None, :, :]
    assert out2.shape == (B2, S2, D2)
    assert jnp.allclose(out2, ref2, atol=1e-6), "mismatch (tiled path)"

    # --- Case 3: non-divisible seq (S=10) -> masked partial last seq tile
    B3, S3, D3, L3 = 3, 10, 128, 64
    x3 = jax.random.normal(k5, (B3, S3, D3), dtype=jnp.float32)
    tbl3 = jax.random.normal(k6, (L3, D3), dtype=jnp.float32)
    out3 = jax.block_until_ready(learned_positional_encoding(x3, tbl3))
    ref3 = x3 + tbl3[:S3][None, :, :]
    assert out3.shape == (B3, S3, D3)
    assert jnp.allclose(out3, ref3, atol=1e-6), "mismatch (masked tile path)"

    print("KERNEL_OK")
</pallas_src>

<mosaic_0001>
module attributes {stable_mosaic.version = 11 : i64} {
  func.func @_add_kernel(%arg0: i32, %arg1: i32, %arg2: memref<2x128xf32, #tpu.memory_space<vmem>>, %arg3: memref<1x128xf32, #tpu.memory_space<vmem>>, %arg4: memref<2x128xf32, #tpu.memory_space<vmem>>) attributes {dimension_semantics = [#tpu.dimension_semantics<parallel>, #tpu.dimension_semantics<parallel>], iteration_bounds = array<i64: 2, 1>, scalar_prefetch = 0 : i64, scratch_operands = 0 : i64, tpu.core_type = #tpu.core_type<tc>, window_params = [{transform_indices = @transform_0, window_bounds = array<i64: 2, 128>}, {transform_indices = @transform_1, window_bounds = array<i64: 1, 128>}, {transform_indices = @transform_2, window_bounds = array<i64: 2, 128>}]} {
    %c0 = arith.constant 0 : index
    %c0_0 = arith.constant 0 : index
    %0 = vector.load %arg2[%c0, %c0_0] : memref<2x128xf32, #tpu.memory_space<vmem>>, vector<2x128xf32>
    %c0_1 = arith.constant 0 : index
    %c0_2 = arith.constant 0 : index
    %1 = vector.load %arg3[%c0_1, %c0_2] : memref<1x128xf32, #tpu.memory_space<vmem>>, vector<1x128xf32>
    %2 = vector.broadcast %1 : vector<1x128xf32> to vector<2x128xf32>
    %3 = arith.addf %0, %2 : vector<2x128xf32>
    %c0_3 = arith.constant 0 : index
    %c0_4 = arith.constant 0 : index
    %4 = vector.load %arg4[%c0_3, %c0_4] : memref<2x128xf32, #tpu.memory_space<vmem>>, vector<2x128xf32>
    tpu.vector_store %arg4[%c0_3, %c0_4], %3 {strides = array<i32>} : memref<2x128xf32, #tpu.memory_space<vmem>>, vector<2x128xf32>,
    return
  }
  func.func @transform_0(%arg0: i32, %arg1: i32) -> (i32, i32) {
    %c0_i32 = arith.constant 0 : i32
    return %arg1, %arg0 : i32, i32
  }
  func.func @transform_1(%arg0: i32, %arg1: i32) -> (i32, i32) {
    %c0_i32 = arith.constant 0 : i32
    %c0_i32_0 = arith.constant 0 : i32
    return %c0_i32, %arg0 : i32, i32
  }
  func.func @transform_2(%arg0: i32, %arg1: i32) -> (i32, i32) {
    %c0_i32 = arith.constant 0 : i32
    return %arg1, %arg0 : i32, i32
  }
}

</mosaic_0001>

<bundles_post_ra>
// kernel: tpu_custom_call.1
= control target key start
LH: loop header
LB: loop body
LE: loop exit
PB: predicated region body
PF: predicated region fallthrough
CT: control target
= control target key end

     0   :  { %7 = vsyncpa [#allocation3], 0  ;;  %s692_s0 = inlined_call_operand.hbm [shape: f32[2,256], index: 0, kind: input, shape index: {}]   ;;  %s693_s1 = inlined_call_operand.vmem [shape: f32[1,256], index: 1, kind: input, shape index: {}]   ;;  %s694_s2 = inlined_call_operand.hbm [shape: f32[2,256], index: 2, kind: output, shape index: {}]  }
   0x1   :  { %9 = vsyncpa [#allocation3 + $0x1], 0 }
   0x2   :  { %10 = vsyncpa [#allocation4], 0 }
   0x3   :  { %12 = vsyncpa [#allocation4 + $0x1], 0  ;;  %s515_s9 = smov 0   ;;  %s517_s10 = smov 0  }
   0x4   :  { %s519_s11 = smov 0   ;;  %s521_s12 = smov 0  }
   0x5   :  { %s523_s13 = smov 0   ;;  %s525_s14 = smov 0  }
   0x6 LB: > { %s308_s15 = sadd.s32 4294967295, %s496_s14   ;;  %s309_s16 = sadd.s32 4294967294, %s496_s14   ;;  %s496_s14 = sphi %s525_s14, %s18_s14   ;;  %s492_s13 = sphi %s523_s13, %s710_s13   ;;  %s488_s12 = sphi %s521_s12, %s709_s12   ;;  %s484_s11 = sphi %s519_s11, %s708_s11   ;;  %s480_s10 = sphi %s517_s10, %s707_s10   ;;  %s476_s9 = sphi %s515_s9, %s706_s9  }
   0x7   : > { %s30_s17 = sadd.s32 1, %s492_s13  ;;  %s39_s18 = sadd.s32 1, %s484_s11 }
   0x8   : > { %p32_p0 = scmp.ge.s32.totalorder %s30_s17, 2  ;;  %p46_p1 = scmp.ne.s32.totalorder %s484_s11, %s480_s10 }
   0x9   : > { %p47_p2 = scmp.eq.s32.totalorder %s496_s14, 0  ;;  %p52_p3 = scmp.ne.s32.totalorder %s480_s10, %s476_s9 }
   0xa   : > { %s712_s17 = smov (%p32_p0, %s30_s17), 0  ;;  %p53_p5 = scmp.eq.s32.totalorder %s308_s15, 0 }
   0xb   : > { %p556_p4 = por %p47_p2, %p46_p1  ;;  %s35_s20 = ssub.s32 %s492_s13, %s712_s17 }
   0xc   : > { %p104_p6 = scmp.eq.s32.totalorder %s308_s15, 1  ;;  %p37_p7 = scmp.eq.s32.totalorder %s35_s20, 0 }
   0xd   : > { %p562_p8 = por %p53_p5, %p52_p3  ;;  %p110_p10 = scmp.eq.s32.totalorder %s309_s16, 1 }
   0xe   : > { %p566_p9 = por %p104_p6, %p46_p1  ;;  %p334_p13 = scmp.lt.s32.totalorder %s496_s14, 2 }
   0xf   : > { %s571_s23 = scalar_select %p37_p7, %s484_s11, %s39_s18  }
  0x10   : > { %s698_s22 = scalar_select %p566_p9, 1, 0 }
  0x11   : > { %p573_p11 = por %p110_p10, %p52_p3  ;;  %s130_s25 = sand.u32 1, %s484_s11  }
  0x12   : > { %s312_s26 = sshll.u32 %s130_s25, 1  ;;  %s313_s27 = sshll.u32 %s492_s13, 5 }
  0x13   : > { %s699_s24 = scalar_select %p573_p11, 1, 0 }
  0x14   : > { %s584_s30 = scalar_lea.hbm %s692_s0, %s313_s27  ;;  %s134_s3 = scalar_lea.vmem [#allocation2], %s312_s26 }
  0x15   : > { %s143_s4 = sshll.u32 %s134_s3, 4  ;;  %p590_p0 = pnand %p334_p13, %p556_p4  ;;  %s586_s4 = int_to_ptr.vmem [resolvable:$true] %s143_s4 }
  0x16   : > { %s131_s6 = scalar_lea.sflag [#allocation3], %s130_s25  ;;  %s384_s7 = scalar_lea.hbm %s584_s30, 32 }
  0x17   : > { %p385_p3 = scmp.ne.s32.totalorder %s584_s30, %s384_s7  ;;  %p386_p5 = pneg %p590_p0 }
  0x18   : > { %s389_s16 = scalar_lea.hbm %s692_s0, 64  ;;  %p390_p4 = scmp.lt.u32.totalorder %s584_s30, %s692_s0 }
  0x19   : > { %p387_p6 = pnand %p386_p5, %p385_p3  ;;  %p391_p10 = scmp.lt.u32.totalorder %s389_s16, %s384_s7 }
  0x1a   : > { %p393_p12 = scmp.lt.u32.totalorder %s384_s7, %s584_s30 }
  0x1b   : > { %p388_p7 = pneg %p387_p6  ;;  %p392_p13 = por %p391_p10, %p390_p4 }
  0x1d   : > { %p394_p1 = por %p393_p12, %p392_p13 }
  0x1f   : > { %p395_p2 = pnand %p394_p1, %p388_p7 }
  0x21   : > { %398 = shalt.err (!%p395_p2)
}
  0x22   : > { %s399_s20 = scalar_lea.vmem %s586_s4, 32  ;;  %s498_s25 = smov [#allocation2]  }
  0x23   : > { %p400_p3 = scmp.ne.s32.totalorder %s586_s4, %s399_s20  ;;  %s404_s26 = sshll.u32 %s498_s25, 4  ;;  %s405_s26 = int_to_ptr.vmem [resolvable:$false] %s404_s26 }
  0x24   : > { %s406_s27 = scalar_lea.vmem %s405_s26, 64  ;;  %p407_p9 = scmp.lt.s32.totalorder %s586_s4, %s405_s26 }
  0x25   : > { %p402_p6 = pnand %p400_p3, %p386_p5  ;;  %p408_p4 = scmp.lt.s32.totalorder %s406_s27, %s399_s20 }
  0x27   : > { %p403_p11 = pneg %p402_p6  ;;  %p409_p10 = por %p408_p4, %p407_p9 }
  0x29   : > { %p410_p12 = pnand %p409_p10, %p403_p11 }
  0x2b   : > { %413 = shalt.err (!%p410_p12)
}
  0x2c   : > { %329 = dma.hbm_to_vmem [thread:$0]  (!%p590_p0), %s584_s30, 32, %s586_s4, %s131_s6  }
  0x2d   : > { %p701_p1 = scmp.lt.s32.totalorder %s496_s14, 3  ;;  %p702_p2 = scmp.ge.s32.totalorder %s496_s14, 1 }
  0x2f   : > { %p155_p5 = pnand %p702_p2, %p701_p1 }
  0x30   : > { %s626_s28 = sand.u32 (!%p155_p5), 1, %s480_s10  }
  0x31   : > { %158 = sbr.rel (%p155_p5) target bundleno = 85 (0x55), region = 28  ;;  %s315_s29 = sshll.u32 (!%p155_p5), %s626_s28, 1 }
  0x32   : > { %s161_s3 = scalar_lea.sflag (!%p155_p5), [#allocation3], %s626_s28  ;;  %s164_s7 = scalar_lea.vmem (!%p155_p5), [#allocation2], %s315_s29 }
  0x38   : > { %467 = dma.done.wait (%p562_p8), %s161_s3, 32  }
  0x39   : > { %469 = vsyncadd (%p562_p8), %s161_s3, 4294967264  ;;  %p188_p9 = scmp.lt.s32.totalorder %s488_s12, 1  ;;  %s187_s8 = scalar_lea.vmem [#allocation5], %s315_s29  ;;  %v191_v0 = vld [vmem:[%s164_s7] sm:$0x3] }
  0x3a   : > { %s217_s15 = sshll.u32 %s187_s8, 4  ;;  %s319_s16 = sshll.u32 %s488_s12, 5  ;;  %s640_s15 = int_to_ptr.vmem [resolvable:$true] %s217_s15 }
  0x3b   : > { %s189_s30 = scalar_select %p188_p9, %s488_s12, 1 }
  0x3c   : > { %s645_s19 = scalar_lea.hbm %s694_s2, %s319_s16  ;;  %s202_s20 = scalar_lea.sflag [#allocation4], %s626_s28 }
  0x3d   : > { %s190_s6 = scalar_lea.vmem %s693_s1, %s189_s30  ;;  %s414_s25 = scalar_lea.vmem %s640_s15, 32 }
  0x3e   : > { %v317_v1 = vld [vmem:[%s190_s6] ss:$0 sm:$0xff]  ;;  %p415_p8 = scmp.ne.s32.totalorder %s640_s15, %s414_s25  ;;  %p703_p11 = scmp.ne.s32.totalorder %s698_s22, 0 }
  0x3f   : > { %v199_v2 = vadd.f32 %v317_v1, %v191_v0  ;;  %s499_s12 = smov [#allocation5]  }
  0x40   : > { %p416_p0 = pnand %p415_p8, %p703_p11  ;;  %s418_s26 = sshll.u32 %s499_s12, 4  ;;  %s419_s26 = int_to_ptr.vmem [resolvable:$false] %s418_s26 }
  0x41   : > { %200 = vst [vmem:[%s187_s8] sm:$0x3] %v199_v2  ;;  %s420_s27 = scalar_lea.vmem %s419_s26, 64  ;;  %p421_p13 = scmp.lt.s32.totalorder %s640_s15, %s419_s26 }
  0x42   : > { %p417_p7 = pneg %p416_p0  ;;  %p422_p3 = scmp.lt.s32.totalorder %s420_s27, %s414_s25 }
  0x44   : > { %p423_p6 = por %p422_p3, %p421_p13 }
  0x46   : > { %p424_p4 = pnand %p423_p6, %p417_p7 }
  0x48   : > { %427 = shalt.err (!%p424_p4)
}
  0x49   : > { %s428_s28 = scalar_lea.hbm %s645_s19, 32  ;;  %s432_s7 = scalar_lea.hbm %s694_s2, 64 }
  0x4a   : > { %p429_p10 = scmp.ne.s32.totalorder %s645_s19, %s428_s28  ;;  %p433_p2 = scmp.lt.u32.totalorder %s645_s19, %s694_s2 }
  0x4b   : > { %p434_p5 = scmp.lt.u32.totalorder %s432_s7, %s428_s28  ;;  %p436_p8 = scmp.lt.u32.totalorder %s428_s28, %s645_s19 }
  0x4c   : > { %p430_p12 = pnand %p429_p10, %p703_p11 }
  0x4d   : > { %p435_p9 = por %p434_p5, %p433_p2 }
  0x4e   : > { %p431_p1 = pneg %p430_p12 }
  0x4f   : > { %p437_p0 = por %p436_p8, %p435_p9 }
  0x51   : > { %p438_p7 = pnand %p437_p0, %p431_p1 }
  0x53   : > { %441 = shalt.err (!%p438_p7)
}
  0x54   : > { %324 = dma.vmem_to_hbm [thread:$0]  (%p703_p11), %s640_s15, 32, %s645_s19, %s202_s20  }
  0x55 PF: > { %s229_s5 = sand.u32 1, %s476_s9   ;;  %p704_p13 = scmp.ne.s32.totalorder %s699_s24, 0 }
  0x56   : > { %p705_p3 = scmp.ge.s32.totalorder %s496_s14, 2  ;;  %s230_s6 = scalar_lea.sflag [#allocation4], %s229_s5 }
  0x58   : > { %p331_p6 = pnand %p705_p3, %p704_p13 }
  0x5a   : > { %471 = dma.done.wait (!%p331_p6), %s230_s6, 32  }
  0x5b   : > { %473 = vsyncadd (!%p331_p6), %s230_s6, 4294967264  ;;  %s18_s14 = sadd.s32 1, %s496_s14   ;;  %s706_s9 = smov %s480_s10 }
  0x5c   : > { %p15_p4 = scmp.ge.s32.totalorder %s18_s14, 4   ;;  %s707_s10 = smov %s484_s11 }
  0x5d   : > { %s708_s11 = smov %s571_s23  ;;  %s709_s12 = smov %s492_s13 }
  0x5e   : > { %s710_s13 = smov %s712_s17  ;;  %17 = sbr.rel (!%p15_p4) target bundleno = 6 (0x6), region = 76 }
  0x65   :  { %235 = vsyncpa [#allocation3], 1 }
  0x66   :  { %237 = vsyncpa [#allocation3 + $0x1], 1 }
  0x67   :  { %238 = vsyncpa [#allocation4], 1 }
  0x68   :  { %240 = vsyncpa [#allocation4 + $0x1], 1 }

</bundles_post_ra>
